<compile_context>
chip_gen: v5e
topology: v5e:2x2
jax: 0.10.0
libtpu: 0.0.40
codegen_flags: <defaults>
</compile_context>

<pallas_src>
import functools

import jax
import jax.numpy as jnp
from jax.experimental import pallas as pl
from jax.experimental.pallas import tpu as pltpu

INPUT_SIZE = 182
HIDDEN1 = 128
HIDDEN2 = 64
OUTPUT_SIZE = 2

# HIDDEN2 is lane-padded to 128 so the h2 intermediate and the fc2 matmul are
# full-lane; the padded columns/rows are exact zeros (ReLU(0)=0, 0*w=0).
HIDDEN2_PAD = 128


def _round_up(x, m):
    return (x + m - 1) // m * m


def mlp_kernel(x_ref, w1_ref, b1_ref, w2_ref, b2_ref, w3_ref, b3_ref, o_ref):
    # Fused fc1 -> ReLU -> fc2 -> ReLU -> fc3 on one batch tile.
    # Weight/bias blocks use a grid-invariant index map, so they stay
    # VMEM-resident across all grid steps (only x/out stream from HBM).
    # Dots accumulate in f32; bias-add and ReLU are done in f32 regardless of
    # the input/weight compute dtype (so the bf16 path stays v5e-safe).
    x = x_ref[...]                                                           # (TB, 182)
    h1 = jnp.dot(x, w1_ref[...], preferred_element_type=jnp.float32) + b1_ref[...]
    h1 = jnp.maximum(h1, 0.0)                                                # (TB, 128) f32
    h2 = jnp.dot(h1.astype(w2_ref.dtype), w2_ref[...],
                 preferred_element_type=jnp.float32) + b2_ref[...]
    h2 = jnp.maximum(h2, 0.0)                                                # (TB, 128) f32; lanes 64: are zero
    out = jnp.dot(h2.astype(w3_ref.dtype), w3_ref[...],
                  preferred_element_type=jnp.float32) + b3_ref[...]
    o_ref[...] = out.astype(o_ref.dtype)                                     # (TB, 2)


@functools.partial(jax.jit, static_argnames=("tile_b", "compute_dtype"))
def mlp_forward(x, w1, b1, w2p, b2p, w3p, b3, *, tile_b=2048,
                compute_dtype=jnp.float32):
    """MLP forward pass.

    Params come pre-padded from init_params:
      w1 (182,128) b1 (1,128) w2p (128,128) b2p (1,128) w3p (128,2) b3 (1,2)
    (padded entries are exact zeros, so the math matches the unpadded model).
    compute_dtype controls the x/weight dtype fed to the MXU (f32 or bf16);
    accumulation, bias-add, ReLU and the output are always f32.
    """
    B = x.shape[0]
    cdt = jnp.dtype(compute_dtype)

    x = x.astype(cdt)
    w1 = w1.astype(cdt)
    w2p = w2p.astype(cdt)
    w3p = w3p.astype(cdt)
    b1 = b1.astype(jnp.float32)
    b2p = b2p.astype(jnp.float32)
    b3 = b3.astype(jnp.float32)

    # Batch tile: big enough to amortize per-grid-step overhead (~0.35 us) on
    # this HBM-bound kernel, clamped to a multiple of 8 for small B.
    tb = min(tile_b, _round_up(max(B, 8), 8))
    # v7x has 2 TensorCores: for large batches make sure the 'parallel' grid
    # axis has at least 2 steps so both cores get work (no effect on v5e/v6e).
    if B >= 512:
        tb = min(tb, _round_up((B + 1) // 2, 8))
    tb = max(_round_up(tb, 8), 8)
    grid = (pl.cdiv(B, tb),)

    def row_map(i):     # batch-tiled operands (x, out)
        return (i, 0)

    def const_map(i):   # weights / biases: same block every grid step
        return (0, 0)

    in_bytes = cdt.itemsize
    flops = 2 * B * (INPUT_SIZE * HIDDEN1
                     + HIDDEN1 * HIDDEN2_PAD
                     + HIDDEN2_PAD * OUTPUT_SIZE)
    bytes_accessed = (
        B * INPUT_SIZE * in_bytes + B * OUTPUT_SIZE * 4
        + (INPUT_SIZE * HIDDEN1 + HIDDEN1 * HIDDEN2_PAD
           + HIDDEN2_PAD * OUTPUT_SIZE) * in_bytes
        + (HIDDEN1 + HIDDEN2_PAD + OUTPUT_SIZE) * 4
    )

    return pl.pallas_call(
        mlp_kernel,
        out_shape=jax.ShapeDtypeStruct((B, OUTPUT_SIZE), jnp.float32),
        grid_spec=pltpu.PrefetchScalarGridSpec(
            num_scalar_prefetch=0,
            grid=grid,
            in_specs=[
                pl.BlockSpec((tb, INPUT_SIZE), row_map),
                pl.BlockSpec((INPUT_SIZE, HIDDEN1), const_map),
                pl.BlockSpec((1, HIDDEN1), const_map),
                pl.BlockSpec((HIDDEN1, HIDDEN2_PAD), const_map),
                pl.BlockSpec((1, HIDDEN2_PAD), const_map),
                pl.BlockSpec((HIDDEN2_PAD, OUTPUT_SIZE), const_map),
                pl.BlockSpec((1, OUTPUT_SIZE), const_map),
            ],
            out_specs=pl.BlockSpec((tb, OUTPUT_SIZE), row_map),
        ),
        compiler_params=pltpu.CompilerParams(
            dimension_semantics=("parallel",),
            vmem_limit_bytes=32 * 1024 * 1024,
        ),
        cost_estimate=pl.CostEstimate(
            flops=flops, transcendentals=0, bytes_accessed=bytes_accessed),
    )(x, w1, b1, w2p, b2p, w3p, b3)


def init_params(key):
    """Deterministic init mimicking nn.Linear's U(-1/sqrt(fan_in), 1/sqrt(fan_in)).

    HIDDEN2 padding (64 -> 128) is done once here, out of the forward path.
    """
    ks = jax.random.split(key, 6)

    def linear(kw, kb, fan_in, fan_out):
        bound = float(1.0 / (fan_in ** 0.5))
        # stored as [in, out] so the kernel does x @ W directly
        w = jax.random.uniform(kw, (fan_in, fan_out), jnp.float32, -bound, bound)
        b = jax.random.uniform(kb, (1, fan_out), jnp.float32, -bound, bound)
        return w, b

    w1, b1 = linear(ks[0], ks[1], INPUT_SIZE, HIDDEN1)
    w2, b2 = linear(ks[2], ks[3], HIDDEN1, HIDDEN2)
    w3, b3 = linear(ks[4], ks[5], HIDDEN2, OUTPUT_SIZE)

    # Zero-pad the HIDDEN2 dimension to 128 (exact zeros -> math unchanged).
    w2p = jnp.zeros((HIDDEN1, HIDDEN2_PAD), jnp.float32).at[:, :HIDDEN2].set(w2)
    b2p = jnp.zeros((1, HIDDEN2_PAD), jnp.float32).at[:, :HIDDEN2].set(b2)
    w3p = jnp.zeros((HIDDEN2_PAD, OUTPUT_SIZE), jnp.float32).at[:HIDDEN2, :].set(w3)
    return w1, b1, w2p, b2p, w3p, b3


def mlp_reference(x, w1, b1, w2p, b2p, w3p, b3):
    h1 = jnp.maximum(x @ w1 + b1, 0.0)
    h2 = jnp.maximum(h1 @ w2p + b2p, 0.0)
    return h2 @ w3p + b3


if __name__ == "__main__":
    key = jax.random.PRNGKey(0)
    k_x, k_p = jax.random.split(key)

    B = 32
    x = jax.random.normal(k_x, (B, INPUT_SIZE), dtype=jnp.float32)
    params = init_params(k_p)

    # f32 path (default)
    out = jax.block_until_ready(mlp_forward(x, *params))
    ref = mlp_reference(x, *params)
    assert out.shape == (B, OUTPUT_SIZE)
    assert jnp.allclose(out, ref, atol=1e-4, rtol=1e-4), "f32 mismatch vs JAX reference"

    # Ragged batch (B not a multiple of 8 / tile): checks masked writeback of
    # the final partial tile.
    B2 = 13
    x2 = jax.random.normal(jax.random.PRNGKey(1), (B2, INPUT_SIZE), dtype=jnp.float32)
    out2 = jax.block_until_ready(mlp_forward(x2, *params))
    ref2 = mlp_reference(x2, *params)
    assert out2.shape == (B2, OUTPUT_SIZE)
    assert jnp.allclose(out2, ref2, atol=1e-4, rtol=1e-4), "ragged-batch mismatch"

    # bf16 fast path (halved x HBM traffic); looser tolerance vs f32 reference.
    out_bf16 = jax.block_until_ready(
        mlp_forward(x, *params, compute_dtype=jnp.bfloat16))
    assert jnp.allclose(out_bf16, ref, atol=1e-1, rtol=1e-1), "bf16 path drifted too far"

    print("KERNEL_OK")
</pallas_src>

<mosaic_0001>
module attributes {stable_mosaic.version = 11 : i64} {
  func.func @mlp_kernel(%arg0: i32, %arg1: memref<32x182xf32, #tpu.memory_space<vmem>>, %arg2: memref<182x128xf32, #tpu.memory_space<vmem>>, %arg3: memref<1x128xf32, #tpu.memory_space<vmem>>, %arg4: memref<128x128xf32, #tpu.memory_space<vmem>>, %arg5: memref<1x128xf32, #tpu.memory_space<vmem>>, %arg6: memref<128x2xf32, #tpu.memory_space<vmem>>, %arg7: memref<1x2xf32, #tpu.memory_space<vmem>>, %arg8: memref<32x2xf32, #tpu.memory_space<vmem>>) attributes {dimension_semantics = [#tpu.dimension_semantics<parallel>], iteration_bounds = array<i64: 1>, scalar_prefetch = 0 : i64, scratch_operands = 0 : i64, tpu.core_type = #tpu.core_type<tc>, window_params = [{transform_indices = @transform_0, window_bounds = array<i64: 32, 182>}, {pipeline_mode = #tpu.pipeline_mode<synchronous>, transform_indices = @transform_1, window_bounds = array<i64: 182, 128>}, {pipeline_mode = #tpu.pipeline_mode<synchronous>, transform_indices = @transform_2, window_bounds = array<i64: 1, 128>}, {pipeline_mode = #tpu.pipeline_mode<synchronous>, transform_indices = @transform_3, window_bounds = array<i64: 128, 128>}, {pipeline_mode = #tpu.pipeline_mode<synchronous>, transform_indices = @transform_4, window_bounds = array<i64: 1, 128>}, {pipeline_mode = #tpu.pipeline_mode<synchronous>, transform_indices = @transform_5, window_bounds = array<i64: 128, 2>}, {pipeline_mode = #tpu.pipeline_mode<synchronous>, transform_indices = @transform_6, window_bounds = array<i64: 1, 2>}, {transform_indices = @transform_7, window_bounds = array<i64: 32, 2>}]} {
    %c0 = arith.constant 0 : index
    %c0_0 = arith.constant 0 : index
    %0 = vector.load %arg1[%c0, %c0_0] : memref<32x182xf32, #tpu.memory_space<vmem>>, vector<32x182xf32>
    %c0_1 = arith.constant 0 : index
    %c0_2 = arith.constant 0 : index
    %1 = vector.load %arg2[%c0_1, %c0_2] : memref<182x128xf32, #tpu.memory_space<vmem>>, vector<182x128xf32>
    %cst = arith.constant dense<0.000000e+00> : vector<32x128xf32>
    %2 = tpu.matmul %0, %1, %cst {dimension_numbers = #tpu.dot_dimension_numbers<[1], [0], [0], [1], [0, 0, 1, 1], [], []>} : vector<32x182xf32>, vector<182x128xf32>, vector<32x128xf32> -> vector<32x128xf32>
    %c0_3 = arith.constant 0 : index
    %c0_4 = arith.constant 0 : index
    %3 = vector.load %arg3[%c0_3, %c0_4] : memref<1x128xf32, #tpu.memory_space<vmem>>, vector<1x128xf32>
    %4 = vector.broadcast %3 : vector<1x128xf32> to vector<32x128xf32>
    %5 = arith.addf %2, %4 : vector<32x128xf32>
    %cst_5 = arith.constant 0.000000e+00 : f32
    %6 = vector.broadcast %cst_5 : f32 to vector<32x128xf32>
    %7 = arith.maximumf %5, %6 : vector<32x128xf32>
    %c0_6 = arith.constant 0 : index
    %c0_7 = arith.constant 0 : index
    %8 = vector.load %arg4[%c0_6, %c0_7] : memref<128x128xf32, #tpu.memory_space<vmem>>, vector<128x128xf32>
    %cst_8 = arith.constant dense<0.000000e+00> : vector<32x128xf32>
    %9 = tpu.matmul %7, %8, %cst_8 {dimension_numbers = #tpu.dot_dimension_numbers<[1], [0], [0], [1], [0, 0, 1, 1], [], []>} : vector<32x128xf32>, vector<128x128xf32>, vector<32x128xf32> -> vector<32x128xf32>
    %c0_9 = arith.constant 0 : index
    %c0_10 = arith.constant 0 : index
    %10 = vector.load %arg5[%c0_9, %c0_10] : memref<1x128xf32, #tpu.memory_space<vmem>>, vector<1x128xf32>
    %11 = vector.broadcast %10 : vector<1x128xf32> to vector<32x128xf32>
    %12 = arith.addf %9, %11 : vector<32x128xf32>
    %cst_11 = arith.constant 0.000000e+00 : f32
    %13 = vector.broadcast %cst_11 : f32 to vector<32x128xf32>
    %14 = arith.maximumf %12, %13 : vector<32x128xf32>
    %c0_12 = arith.constant 0 : index
    %c0_13 = arith.constant 0 : index
    %15 = vector.load %arg6[%c0_12, %c0_13] : memref<128x2xf32, #tpu.memory_space<vmem>>, vector<128x2xf32>
    %cst_14 = arith.constant dense<0.000000e+00> : vector<32x2xf32>
    %16 = tpu.matmul %14, %15, %cst_14 {dimension_numbers = #tpu.dot_dimension_numbers<[1], [0], [0], [1], [0, 0, 1, 1], [], []>} : vector<32x128xf32>, vector<128x2xf32>, vector<32x2xf32> -> vector<32x2xf32>
    %c0_15 = arith.constant 0 : index
    %c0_16 = arith.constant 0 : index
    %17 = vector.load %arg7[%c0_15, %c0_16] : memref<1x2xf32, #tpu.memory_space<vmem>>, vector<1x2xf32>
    %18 = vector.broadcast %17 : vector<1x2xf32> to vector<32x2xf32>
    %19 = arith.addf %16, %18 : vector<32x2xf32>
    %c0_17 = arith.constant 0 : index
    %c0_18 = arith.constant 0 : index
    %20 = vector.load %arg8[%c0_17, %c0_18] : memref<32x2xf32, #tpu.memory_space<vmem>>, vector<32x2xf32>
    tpu.vector_store %arg8[%c0_17, %c0_18], %19 {strides = array<i32>} : memref<32x2xf32, #tpu.memory_space<vmem>>, vector<32x2xf32>,
    return
  }
  func.func @transform_0(%arg0: i32) -> (i32, i32) {
    %c0_i32 = arith.constant 0 : i32
    %c0_i32_0 = arith.constant 0 : i32
    return %arg0, %c0_i32 : i32, i32
  }
  func.func @transform_1(%arg0: i32) -> (i32, i32) {
    %c0_i32 = arith.constant 0 : i32
    %c0_i32_0 = arith.constant 0 : i32
    %c0_i32_1 = arith.constant 0 : i32
    return %c0_i32, %c0_i32_0 : i32, i32
  }
  func.func @transform_2(%arg0: i32) -> (i32, i32) {
    %c0_i32 = arith.constant 0 : i32
    %c0_i32_0 = arith.constant 0 : i32
    %c0_i32_1 = arith.constant 0 : i32
    return %c0_i32, %c0_i32_0 : i32, i32
  }
  func.func @transform_3(%arg0: i32) -> (i32, i32) {
    %c0_i32 = arith.constant 0 : i32
    %c0_i32_0 = arith.constant 0 : i32
    %c0_i32_1 = arith.constant 0 : i32
    return %c0_i32, %c0_i32_0 : i32, i32
  }
  func.func @transform_4(%arg0: i32) -> (i32, i32) {
    %c0_i32 = arith.constant 0 : i32
    %c0_i32_0 = arith.constant 0 : i32
    %c0_i32_1 = arith.constant 0 : i32
    return %c0_i32, %c0_i32_0 : i32, i32
  }
  func.func @transform_5(%arg0: i32) -> (i32, i32) {
    %c0_i32 = arith.constant 0 : i32
    %c0_i32_0 = arith.constant 0 : i32
    %c0_i32_1 = arith.constant 0 : i32
    return %c0_i32, %c0_i32_0 : i32, i32
  }
  func.func @transform_6(%arg0: i32) -> (i32, i32) {
    %c0_i32 = arith.constant 0 : i32
    %c0_i32_0 = arith.constant 0 : i32
    %c0_i32_1 = arith.constant 0 : i32
    return %c0_i32, %c0_i32_0 : i32, i32
  }
  func.func @transform_7(%arg0: i32) -> (i32, i32) {
    %c0_i32 = arith.constant 0 : i32
    %c0_i32_0 = arith.constant 0 : i32
    return %arg0, %c0_i32 : i32, i32
  }
}

</mosaic_0001>

<bundles_post_ra>
// kernel: mlp_forward.1
= control target key start
LH: loop header
LB: loop body
LE: loop exit
PB: predicated region body
PF: predicated region fallthrough
CT: control target
= control target key end

     0   :  { %12 = vsyncpa [#allocation3], 0  ;;  %s524_s0 = inlined_call_operand.hbm [shape: f32[32,182], index: 0, kind: input, shape index: {}]   ;;  %s525_s1 = inlined_call_operand.hbm [shape: f32[182,128], index: 1, kind: input, shape index: {}]   ;;  %s526_s2 = inlined_call_operand.vmem [shape: f32[1,128], index: 2, kind: input, shape index: {}]   ;;  %s527_s3 = inlined_call_operand.vmem [shape: f32[128,128], index: 3, kind: input, shape index: {}]   ;;  %s528_s4 = inlined_call_operand.vmem [shape: f32[1,128], index: 4, kind: input, shape index: {}]   ;;  %s529_s5 = inlined_call_operand.vmem [shape: f32[128,2], index: 5, kind: input, shape index: {}]   ;;  %s530_s6 = inlined_call_operand.vmem [shape: f32[1,2], index: 6, kind: input, shape index: {}]   ;;  %s531_s7 = inlined_call_operand.vmem [shape: f32[32,2], index: 7, kind: output, shape index: {}]  }
   0x1   :  { %s18_s26 = sshll.u32 %s524_s0, 4  ;;  %s19_s26 = int_to_ptr.hbm [resolvable:$true] %s18_s26 }
   0x2   :  { %13 = vsyncpa [#allocation5], 0  ;;  %s351_s27 = smov [#allocation2]   ;;  %s31_s8 = sshll.u32 %s525_s1, 4  ;;  %s32_s8 = int_to_ptr.hbm [resolvable:$true] %s31_s8 }
   0x3   :  { %s20_s28 = sshll.u32 %s351_s27, 4  ;;  %s352_s9 = smov 256   ;;  %s21_s28 = int_to_ptr.vmem [resolvable:$true] %s20_s28 }
   0x4   :  { %s353_s10 = smov 16   ;;  %s354_s11 = smov [#allocation4]  }
   0x5   :  { %26 = dma.hbm_to_vmem [thread:$0]  %s19_s26, 1024, %s21_s28, [#allocation3], %s352_s9, %s352_s9, %s353_s10  }
   0x6   :  { %s33_s12 = sshll.u32 %s354_s11, 4  ;;  %s355_s13 = smov 128   ;;  %s34_s12 = int_to_ptr.vmem [resolvable:$true] %s33_s12 }
   0x7   :  { %s356_s14 = smov 8  }
   0x8   :  { %39 = dma.hbm_to_vmem [thread:$0]  %s32_s8, 2944, %s34_s12, [#allocation5], %s355_s13, %s355_s13, %s356_s14  }
   0x9   :  { %347 = dma.done.wait [#allocation3], 1024  }
   0xa   :  { %348 = vsyncadd [#allocation3], 4294966272 }
   0xb   :  { %349 = dma.done.wait [#allocation5], 2944  }
   0xc   :  { %350 = vsyncadd [#allocation5], 4294964352  ;;  %v81_v0 = vld [vmem:[#allocation4 + $0x78] sm:$0xff]  ;;  %v80_v1 = vld [vmem:[#allocation4 + $0x70] sm:$0xff]  ;;  %vm106_vm0 = vcmask 1045504   ;;  %vm93_vm1 = vcmask 441344  }
   0xd   :  { %110 = vmatpush.msra.mxu0 %v81_v0  ;;  %v79_v2 = vld [vmem:[#allocation4 + $0x68] sm:$0xff]  ;;  %v88_v3 = vld [vmem:[#allocation4 + $0xb0] sm:$0x3f]  ;;  %v78_v4 = vld [vmem:[#allocation4 + $0x60] sm:$0xff]  ;;  %vm274_vm2 = vcmask 15360  }
   0xe   :  { %285 = vmatpush.msk.msra.mxu1 %vm106_vm0, %v88_v3  ;;  %v87_v5 = vld [vmem:[#allocation4 + $0xa8] sm:$0xff]  ;;  %v86_v6 = vld [vmem:[#allocation4 + $0xa0] sm:$0xff]  ;;  %v77_v7 = vld [vmem:[#allocation4 + $0x58] sm:$0xff] }
   0xf   :  { %111 = vmatpush.msra.mxu0 %v80_v1  ;;  %v85_v8 = vld [vmem:[#allocation4 + $0x98] sm:$0xff]  ;;  %v76_v9 = vld [vmem:[#allocation4 + $0x50] sm:$0xff]  ;;  %v75_v11 = vld [vmem:[#allocation4 + $0x48] sm:$0xff] }
  0x10   :  { %149 = vmatpush.msra.mxu1 %v87_v5  ;;  %v84_v10 = vld [vmem:[#allocation4 + $0x90] sm:$0xff]  ;;  %v83_v12 = vld [vmem:[#allocation4 + $0x88] sm:$0xff]  ;;  %v74_v13 = vld [vmem:[#allocation4 + $0x40] sm:$0xff] }
  0x11   :  { %112 = vmatpush.msra.mxu0 %v79_v2  ;;  %v82_v14 = vld [vmem:[#allocation4 + $0x80] sm:$0xff]  ;;  %v73_v15 = vld [vmem:[#allocation4 + $0x38] sm:$0xff]  ;;  %v59_v16 = vld [vmem:[#allocation2 + $0x8] sm:$0xff] }
  0x12   :  { %150 = vmatpush.msra.mxu1 %v86_v6  ;;  %v72_v17 = vld [vmem:[#allocation4 + $0x30] sm:$0xff]  ;;  %v71_v18 = vld [vmem:[#allocation4 + $0x28] sm:$0xff]  ;;  %v70_v19 = vld [vmem:[#allocation4 + $0x20] sm:$0xff] }
  0x13   :  { %113 = vmatpush.msra.mxu0 %v78_v4  ;;  %v69_v20 = vld [vmem:[#allocation4 + $0x18] sm:$0xff]  ;;  %v68_v22 = vld [vmem:[#allocation4 + $0x10] sm:$0xff]  ;;  %v67_v25 = vld [vmem:[#allocation4 + $0x8] sm:$0xff] }
  0x14   :  { %151 = vmatpush.msra.mxu1 %v85_v8  ;;  %v61_v21 = vld [vmem:[#allocation2 + $0x18] sm:$0xff]  ;;  %v186_v24 = vld [vmem:[%s527_s3 + $0x70] sm:$0xff]  ;;  %v185_v26 = vld [vmem:[%s527_s3 + $0x68] sm:$0xff] }
  0x15   :  { %114 = vmatpush.msra.mxu0 %v77_v7  ;;  %v187_v23 = vld [vmem:[%s527_s3 + $0x78] sm:$0xff]  ;;  %v66_v27 = vld [vmem:[#allocation4] sm:$0xff]  ;;  %v63_v30 = vld [vmem:[#allocation2 + $0x28] sm:$0xff] }
  0x16   :  { %152 = vmatpush.msra.mxu1 %v84_v10  ;;  %192 = vmatpush.msra.mxu2 %v187_v23  ;;  %v58_v28 = vld [vmem:[#allocation2] sm:$0xff]  ;;  %v183_v31 = vld [vmem:[%s527_s3 + $0x58] sm:$0xff]  ;;  %v182_v32 = vld [vmem:[%s527_s3 + $0x50] sm:$0xff] }
  0x17   :  { %115 = vmatpush.msra.mxu0 %v76_v9  ;;  %v184_v29 = vld [vmem:[%s527_s3 + $0x60] sm:$0xff]  ;;  %v181_v33 = vld [vmem:[%s527_s3 + $0x48] sm:$0xff]  ;;  %v60_v34 = vld [vmem:[#allocation2 + $0x10] sm:$0xff] }
  0x18   :  { %153 = vmatpush.msra.mxu1 %v83_v12  ;;  %193 = vmatpush.msra.mxu2 %v186_v24  ;;  %v180_v35 = vld [vmem:[%s527_s3 + $0x40] sm:$0xff]  ;;  %v65_v36 = vld [vmem:[#allocation2 + $0x38] sm:$0xff]  ;;  %v178_v38 = vld [vmem:[%s527_s3 + $0x30] sm:$0xff] }
  0x19   :  { %116 = vmatpush.msra.mxu0 %v75_v11  ;;  %v179_v37 = vld [vmem:[%s527_s3 + $0x38] sm:$0xff]  ;;  %v177_v39 = vld [vmem:[%s527_s3 + $0x28] sm:$0xff]  ;;  %v62_v40 = vld [vmem:[#allocation2 + $0x20] sm:$0xff] }
  0x1a   :  { %154 = vmatpush.msra.mxu1 %v82_v14  ;;  %194 = vmatpush.msra.mxu2 %v185_v26  ;;  %v176_v41 = vld [vmem:[%s527_s3 + $0x20] sm:$0xff]  ;;  %v64_v42 = vld [vmem:[#allocation2 + $0x30] sm:$0xff]  ;;  %v175_v43 = vld [vmem:[%s527_s3 + $0x18] sm:$0xff] }
  0x1b   :  { %117 = vmatpush.msra.mxu0 %v74_v13  ;;  %286 = vmatmul.msk.f32.vlgmr.msra.gmra.mxu1 %vm93_vm1, %v59_v16  ;;  %v174_v44 = vld [vmem:[%s527_s3 + $0x10] sm:$0xff]  ;;  %v173_v45 = vld [vmem:[%s527_s3 + $0x8] sm:$0xff]  ;;  %v172_v46 = vld [vmem:[%s527_s3] sm:$0xff] }
  0x1c   :  { %195 = vmatpush.msra.mxu2 %v184_v29  ;;  %v296_v48 = vld [vmem:[%s526_s2] ss:$0 sm:$0xff]  ;;  %v240_v49 = vld [vmem:[%s529_s5 + $0x78] sm:$0xff]  ;;  %v239_v50 = vld [vmem:[%s529_s5 + $0x70] sm:$0xff] }
  0x1d   :  { %118 = vmatpush.msra.mxu0 %v73_v15  ;;  %245 = vmatpush.msra.mxu3 %v240_v49  ;;  %v238_v53 = vld [vmem:[%s529_s5 + $0x68] sm:$0xff]  ;;  %v237_v55 = vld [vmem:[%s529_s5 + $0x60] sm:$0xff]  ;;  %v236_v58 = vld [vmem:[%s529_s5 + $0x58] sm:$0xff] }
  0x1e   :  { %196 = vmatpush.msra.mxu2 %v183_v31  ;;  %v235_v59 = vld [vmem:[%s529_s5 + $0x50] sm:$0xff]  ;;  %v234_v62 = vld [vmem:[%s529_s5 + $0x48] sm:$0xff]  ;;  %v233_v0 = vld [vmem:[%s529_s5 + $0x40] sm:$0xff] }
  0x1f   :  { %119 = vmatpush.msra.mxu0 %v72_v17  ;;  %246 = vmatpush.msra.mxu3 %v239_v50  ;;  %v232_v2 = vld [vmem:[%s529_s5 + $0x38] sm:$0xff]  ;;  %v231_v4 = vld [vmem:[%s529_s5 + $0x30] sm:$0xff]  ;;  %v230_v7 = vld [vmem:[%s529_s5 + $0x28] sm:$0xff] }
  0x20   :  { %197 = vmatpush.msra.mxu2 %v182_v32  ;;  %v229_v9 = vld [vmem:[%s529_s5 + $0x20] sm:$0xff]  ;;  %v228_v11 = vld [vmem:[%s529_s5 + $0x18] sm:$0xff]  ;;  %v227_v17 = vld [vmem:[%s529_s5 + $0x10] sm:$0xff] }
  0x21   :  { %120 = vmatpush.msra.mxu0 %v71_v18  ;;  %247 = vmatpush.msra.mxu3 %v238_v53  ;;  %v226_v18 = vld [vmem:[%s529_s5 + $0x8] sm:$0xff] }
  0x22   :  { %198 = vmatpush.msra.mxu2 %v181_v33  ;;  %v298_v33 = vld [vmem:[%s530_s6] ss:$0 sm:$0xff] }
  0x23   :  { %121 = vmatpush.msra.mxu0 %v70_v19  ;;  %287 = vmatmul.msk.f32.gmra.mxu1 %vm93_vm1, %v61_v21  ;;  %v225_v19 = vld [vmem:[%s529_s5] sm:$0xff] }
  0x24   :  { %199 = vmatpush.msra.mxu2 %v180_v35  ;;  %248 = vmatpush.msra.mxu3 %v237_v55 }
  0x25   :  { %122 = vmatpush.msra.mxu0 %v69_v20  ;;  %v297_v20 = vld [vmem:[%s528_s4] ss:$0 sm:$0xff] }
  0x26   :  { %200 = vmatpush.msra.mxu2 %v179_v37  ;;  %249 = vmatpush.msra.mxu3 %v236_v58 }
  0x27   :  { %123 = vmatpush.msra.mxu0 %v68_v22 }
  0x28   :  { %201 = vmatpush.msra.mxu2 %v178_v38  ;;  %250 = vmatpush.msra.mxu3 %v235_v59 }
  0x29   :  { %124 = vmatpush.msra.mxu0 %v67_v25 }
  0x2a   :  { %202 = vmatpush.msra.mxu2 %v177_v39  ;;  %251 = vmatpush.msra.mxu3 %v234_v62 }
  0x2b   :  { %125 = vmatpush.msra.mxu0 %v66_v27  ;;  %288 = vmatmul.msk.f32.gmra.mxu1 %vm93_vm1, %v63_v30 }
  0x2c   :  { %126 = vmatmul.f32.vlgmr.msra.gmra.mxu0 %v58_v28  ;;  %203 = vmatpush.msra.mxu2 %v176_v41 }
  0x2d   :  { %252 = vmatpush.msra.mxu3 %v233_v0 }
  0x2e   :  { %204 = vmatpush.msra.mxu2 %v175_v43 }
  0x2f   :  { %253 = vmatpush.msra.mxu3 %v232_v2 }
  0x30   :  { %205 = vmatpush.msra.mxu2 %v174_v44 }
  0x31   :  { %254 = vmatpush.msra.mxu3 %v231_v4 }
  0x32   :  { %206 = vmatpush.msra.mxu2 %v173_v45 }
  0x33   :  { %289 = vmatmul.msk.f32.gmra.mxu1 %vm93_vm1, %v65_v36  ;;  %255 = vmatpush.msra.mxu3 %v230_v7 }
  0x34   :  { %129 = vmatmul.f32.gmra.mxu0 %v60_v34  ;;  %207 = vmatpush.msra.mxu2 %v172_v46 }
  0x35   :  { %256 = vmatpush.msra.mxu3 %v229_v9 }
  0x37   :  { %257 = vmatpush.msra.mxu3 %v228_v11 }
  0x39   :  { %258 = vmatpush.msra.mxu3 %v227_v17 }
  0x3b   :  { %259 = vmatpush.msra.mxu3 %v226_v18 }
  0x3c   :  { %132 = vmatmul.f32.gmra.mxu0 %v62_v40 }
  0x3d   :  { %260 = vmatpush.msra.mxu3 %v225_v19 }
  0x44   :  { %135 = vmatmul.f32.gmra.mxu0 %v64_v42 }
  0x98   :  { %v156_v47 = vpop.f32.mrf.mxu1 }
  0xa0   :  { %v159_v56 = vpop.f32.mrf.mxu1 }
  0xa8   :  { %v162_v3 = vpop.f32.mrf.mxu1 }
  0xa9   :  { %v127_v51 = vpop.f32.mrf.mxu0 }
  0xaa   :  { %v128_v52 = vadd.f32 %v296_v48, %v127_v51 }
  0xac   :  { %v157_v54 = vadd.f32 %v156_v47, %v128_v52 }
  0xae   :  { %v168_v57 = vmax.f32 %v157_v54, 0.0 }
  0xb0   :  { %208 = vmatmul.f32.vlgmr.msra.gmra.mxu2 %v168_v57  ;;  %v165_v13 = vpop.f32.mrf.mxu1 }
  0xb1   :  { %v130_v60 = vpop.f32.mrf.mxu0 }
  0xb2   :  { %v131_v61 = vadd.f32 %v296_v48, %v130_v60 }
  0xb4   :  { %v160_v63 = vadd.f32 %v159_v56, %v131_v61 }
  0xb6   :  { %v169_v1 = vmax.f32 %v160_v63, 0.0 }
  0xb8   :  { %211 = vmatmul.f32.gmra.mxu2 %v169_v1 }
  0xb9   :  { %v133_v5 = vpop.f32.mrf.mxu0 }
  0xba   :  { %v134_v6 = vadd.f32 %v296_v48, %v133_v5 }
  0xbc   :  { %v163_v8 = vadd.f32 %v162_v3, %v134_v6 }
  0xbe   :  { %v170_v10 = vmax.f32 %v163_v8, 0.0 }
  0xc0   :  { %214 = vmatmul.f32.gmra.mxu2 %v170_v10 }
  0xc1   :  { %v136_v12 = vpop.f32.mrf.mxu0 }
  0xc2   :  { %v137_v14 = vadd.f32 %v296_v48, %v136_v12 }
  0xc4   :  { %v166_v15 = vadd.f32 %v165_v13, %v137_v14 }
  0xc6   :  { %v171_v16 = vmax.f32 %v166_v15, 0.0 }
  0xc8   :  { %217 = vmatmul.f32.gmra.mxu2 %v171_v16 }
 0x133   :  { %v209_v21 = vpop.f32.mrf.mxu2 }
 0x134   :  { %v210_v22 = vadd.f32 %v297_v20, %v209_v21 }
 0x136   :  { %v221_v23 = vmax.f32 %v210_v22, 0.0 }
 0x138   :  { %261 = vmatmul.f32.vlgmr.msra.gmra.mxu3 %v221_v23 }
 0x13b   :  { %v212_v24 = vpop.f32.mrf.mxu2 }
 0x13c   :  { %v213_v25 = vadd.f32 %v297_v20, %v212_v24 }
 0x13e   :  { %v222_v26 = vmax.f32 %v213_v25, 0.0 }
 0x140   :  { %264 = vmatmul.f32.gmra.mxu3 %v222_v26 }
 0x143   :  { %v215_v27 = vpop.f32.mrf.mxu2 }
 0x144   :  { %v216_v28 = vadd.f32 %v297_v20, %v215_v27 }
 0x146   :  { %v223_v29 = vmax.f32 %v216_v28, 0.0 }
 0x148   :  { %267 = vmatmul.f32.gmra.mxu3 %v223_v29 }
 0x14b   :  { %v218_v30 = vpop.f32.mrf.mxu2 }
 0x14c   :  { %v219_v31 = vadd.f32 %v297_v20, %v218_v30 }
 0x14e   :  { %v224_v32 = vmax.f32 %v219_v31, 0.0 }
 0x150   :  { %270 = vmatmul.f32.gmra.mxu3 %v224_v32 }
 0x1bb   :  { %v262_v34 = vpop.f32.mrf.mxu3 }
 0x1bc   :  { %v263_v35 = vadd.f32 %v298_v33, %v262_v34 }
 0x1be   :  { %275 = vst.msk [vmem:[%s531_s7] sm:$0xff] %vm274_vm2, %v263_v35 }
 0x1c3   :  { %v265_v36 = vpop.f32.mrf.mxu3 }
 0x1c4   :  { %v266_v37 = vadd.f32 %v298_v33, %v265_v36 }
 0x1c6   :  { %276 = vst.msk [vmem:[%s531_s7 + $0x8] sm:$0xff] %vm274_vm2, %v266_v37 }
 0x1cb   :  { %v268_v38 = vpop.f32.mrf.mxu3 }
 0x1cc   :  { %v269_v39 = vadd.f32 %v298_v33, %v268_v38 }
 0x1ce   :  { %277 = vst.msk [vmem:[%s531_s7 + $0x10] sm:$0xff] %vm274_vm2, %v269_v39 }
 0x1d3   :  { %v271_v40 = vpop.f32.mrf.mxu3 }
 0x1d4   :  { %v272_v41 = vadd.f32 %v298_v33, %v271_v40 }
 0x1d6   :  { %278 = vst.msk [vmem:[%s531_s7 + $0x18] sm:$0xff] %vm274_vm2, %v272_v41 }
 0x1d7   :  { %283 = vsyncpa [#allocation3], 1 }
 0x1d8   :  { %284 = vsyncpa [#allocation5], 1 }

</bundles_post_ra>
